<compile_context>
chip_gen: v6e
topology: v6e:2x2x1
jax: 0.10.0
libtpu: 0.0.40
codegen_flags: <defaults>
</compile_context>

<pallas_src>
import functools

import jax
import jax.numpy as jnp
from jax.experimental import pallas as pl
from jax.experimental.pallas import tpu as pltpu


def _sdpa_kernel(*refs, scale, has_mask):
    if has_mask:
        v_ref, k_ref, q_ref, m_ref, out_ref, w_ref = refs
    else:
        v_ref, k_ref, q_ref, out_ref, w_ref = refs

    q = q_ref[...]                     # (Bt, TQ, Dqk)
    k = k_ref[...]                     # (Bt, Lk, Dqk)
    v = v_ref[...]                     # (Bt, Lk, Dv)

    # QK^T / sqrt(dim_q_k): contract last dims of Q and K directly (no k.T,
    # so no XLU transpose/copy before the MXU push). f32 accumulation.
    s = jnp.einsum("bqd,bkd->bqk", q, k, preferred_element_type=jnp.float32)
    s = s * scale

    if has_mask:
        # masked_fill_(mask, -inf)  (fully-masked rows -> NaN, same as torch)
        s = jnp.where(m_ref[...] != 0, -jnp.inf, s)

    # Numerically-stable softmax along the key axis (f32 vector math).
    row_max = jnp.max(s, axis=-1, keepdims=True)
    exps = jnp.exp(s - row_max)
    denom = jnp.sum(exps, axis=-1, keepdims=True)
    # EUP reciprocal + vmul instead of a VALU divide over TQ*Lk elements.
    attn = exps * pl.reciprocal(denom, approx=False)

    w_ref[...] = attn.astype(w_ref.dtype)

    # attention @ V  (MXU matmul, f32 accumulation)
    out = jnp.einsum("bqk,bkv->bqv", attn.astype(v.dtype), v,
                     preferred_element_type=jnp.float32)
    out_ref[...] = out.astype(out_ref.dtype)


def scaled_dot_product_attention(value, key, query, mask=None,
                                 *, tile_q=None, block_b=None):
    """Pallas implementation of softmax(QK^T / sqrt(d)) V.

    Returns (attention, attention_weights), same as the PyTorch module.
    Pass Q/K/V in bfloat16 on v6e/v7x to use the bf16 MXU path; softmax math
    and accumulation stay in f32 either way.
    """
    B, Lk, Dv = value.shape
    Bk, Lk2, Dqk = key.shape
    Bq, Lq, Dqk2 = query.shape
    assert B == Bk == Bq and Lk == Lk2 and Dqk == Dqk2

    scale = float(Dqk) ** -0.5
    has_mask = mask is not None

    w_dtype = jnp.result_type(query.dtype, key.dtype)
    o_dtype = jnp.result_type(w_dtype, value.dtype)

    # ---- q-axis tiling (keeps score/mask/weights slabs inside VMEM) --------
    if tile_q is None:
        tile_q = Lq if Lq <= 256 else 256   # 256 fills the 2x256^2 MXU (v6e/v7x)
    lq_pad = ((Lq + tile_q - 1) // tile_q) * tile_q
    num_q_tiles = lq_pad // tile_q

    mask_i8 = None
    if has_mask:
        mask_i8 = jnp.asarray(mask).astype(jnp.int8)   # 4x less DMA than int32

    if lq_pad != Lq:
        pad = lq_pad - Lq
        query = jnp.pad(query, ((0, 0), (0, pad), (0, 0)))
        if has_mask:
            # pad rows unmasked -> valid softmax, sliced away afterwards
            mask_i8 = jnp.pad(mask_i8, ((0, 0), (0, pad), (0, 0)))

    # ---- batch blocking (amortize ~0.35us/step overhead on tiny problems) --
    if block_b is None:
        if num_q_tiles == 1:
            itemsize = jnp.dtype(query.dtype).itemsize
            per_b = (Lk * (Dqk + Dv) * itemsize            # K, V
                     + tile_q * (Dqk + Dv) * itemsize       # Q, out
                     + tile_q * Lk * (4 + 4 + (1 if has_mask else 0)))
            block_b = B if per_b * B <= (4 << 20) else 1
        else:
            block_b = 1
    num_b_blocks = B // block_b

    kernel = functools.partial(_sdpa_kernel, scale=scale, has_mask=has_mask)

    in_specs = [
        # K and V are resident across the q-tile axis (index_map ignores qi).
        pl.BlockSpec((block_b, Lk, Dv), lambda b, qi: (b, 0, 0)),     # value
        pl.BlockSpec((block_b, Lk, Dqk), lambda b, qi: (b, 0, 0)),    # key
        pl.BlockSpec((block_b, tile_q, Dqk), lambda b, qi: (b, qi, 0)),  # query
    ]
    inputs = [value, key, query]
    if has_mask:
        in_specs.append(pl.BlockSpec((block_b, tile_q, Lk),
                                     lambda b, qi: (b, qi, 0)))
        inputs.append(mask_i8)

    out_shapes = (
        jax.ShapeDtypeStruct((B, lq_pad, Dv), o_dtype),    # attention
        jax.ShapeDtypeStruct((B, lq_pad, Lk), w_dtype),    # attention_weights
    )
    out_specs = [
        pl.BlockSpec((block_b, tile_q, Dv), lambda b, qi: (b, qi, 0)),
        pl.BlockSpec((block_b, tile_q, Lk), lambda b, qi: (b, qi, 0)),
    ]

    grid_spec = pltpu.PrefetchScalarGridSpec(
        num_scalar_prefetch=0,
        grid=(num_b_blocks, num_q_tiles),
        in_specs=in_specs,
        out_specs=out_specs,
    )

    # TODO(synk): for very long Lk that does not fit VMEM even after q-tiling,
    # add a KV ("arbitrary") reduction axis with online-softmax accumulators.
    attn_out, weights = pl.pallas_call(
        kernel,
        out_shape=out_shapes,
        grid_spec=grid_spec,
        compiler_params=pltpu.CompilerParams(
            dimension_semantics=("parallel", "parallel"),
        ),
    )(*inputs)

    if lq_pad != Lq:
        attn_out = attn_out[:, :Lq, :]
        weights = weights[:, :Lq, :]
    return attn_out, weights


def _reference(value, key, query, mask=None):
    scale = float(key.shape[-1]) ** -0.5
    adj = jnp.einsum("bqd,bkd->bqk", query, key) * scale
    if mask is not None:
        adj = jnp.where(mask != 0, -jnp.inf, adj)
    attn = jax.nn.softmax(adj, axis=-1)
    return jnp.einsum("bqk,bkv->bqv", attn, value), attn


if __name__ == "__main__":
    # ---- small shapes consistent with the module -------------------------
    batch, seq_len, q_len, dim_q_k, dim_v = 2, 8, 8, 32, 32

    root = jax.random.PRNGKey(0)
    kv, kk, kq, km = jax.random.split(root, 4)
    value = jax.random.normal(kv, (batch, seq_len, dim_v), dtype=jnp.float32)
    key = jax.random.normal(kk, (batch, seq_len, dim_q_k), dtype=jnp.float32)
    query = jax.random.normal(kq, (batch, q_len, dim_q_k), dtype=jnp.float32)
    # Deterministic partial mask; at least one legal position per row.
    mask = (jax.random.uniform(km, (batch, q_len, seq_len)) > 0.7)
    mask = mask.at[:, :, 0].set(False)

    # No-mask path (separate kernel variant, no mask stream at all)
    attn, weights = scaled_dot_product_attention(value, key, query, mask=None)
    jax.block_until_ready((attn, weights))
    ref_attn, ref_w = _reference(value, key, query, mask=None)
    assert jnp.allclose(attn, ref_attn, atol=1e-5, rtol=1e-5)
    assert jnp.allclose(weights, ref_w, atol=1e-5, rtol=1e-5)

    # Masked path
    attn_m, weights_m = scaled_dot_product_attention(value, key, query, mask=mask)
    jax.block_until_ready((attn_m, weights_m))
    ref_attn_m, ref_w_m = _reference(value, key, query, mask=mask)
    assert jnp.allclose(attn_m, ref_attn_m, atol=1e-5, rtol=1e-5)
    assert jnp.allclose(weights_m, ref_w_m, atol=1e-5, rtol=1e-5)

    # ---- larger shape exercising q-tiling + Lq padding --------------------
    B2, L2, D2 = 2, 384, 64
    kv2, kk2, kq2, km2 = jax.random.split(jax.random.PRNGKey(1), 4)
    v2 = jax.random.normal(kv2, (B2, L2, D2), dtype=jnp.float32)
    k2 = jax.random.normal(kk2, (B2, L2, D2), dtype=jnp.float32)
    q2 = jax.random.normal(kq2, (B2, L2, D2), dtype=jnp.float32)
    m2 = (jax.random.uniform(km2, (B2, L2, L2)) > 0.8)
    m2 = m2.at[:, :, 0].set(False)

    a2, w2 = scaled_dot_product_attention(v2, k2, q2, mask=m2)
    jax.block_until_ready((a2, w2))
    ra2, rw2 = _reference(v2, k2, q2, mask=m2)
    assert jnp.allclose(a2, ra2, atol=1e-4, rtol=1e-4)
    assert jnp.allclose(w2, rw2, atol=1e-4, rtol=1e-4)

    print("KERNEL_OK")
</pallas_src>

<mosaic_0001>
module attributes {stable_mosaic.version = 11 : i64} {
  func.func @_sdpa_kernel(%arg0: i32, %arg1: i32, %arg2: memref<2x8x32xf32, #tpu.memory_space<vmem>>, %arg3: memref<2x8x32xf32, #tpu.memory_space<vmem>>, %arg4: memref<2x8x32xf32, #tpu.memory_space<vmem>>, %arg5: memref<2x8x32xf32, #tpu.memory_space<vmem>>, %arg6: memref<2x8x8xf32, #tpu.memory_space<vmem>>) attributes {dimension_semantics = [#tpu.dimension_semantics<parallel>, #tpu.dimension_semantics<parallel>], iteration_bounds = array<i64: 1, 1>, scalar_prefetch = 0 : i64, scratch_operands = 0 : i64, tpu.core_type = #tpu.core_type<tc>, window_params = [{transform_indices = @transform_0, window_bounds = array<i64: 2, 8, 32>}, {transform_indices = @transform_1, window_bounds = array<i64: 2, 8, 32>}, {transform_indices = @transform_2, window_bounds = array<i64: 2, 8, 32>}, {transform_indices = @transform_3, window_bounds = array<i64: 2, 8, 32>}, {transform_indices = @transform_4, window_bounds = array<i64: 2, 8, 8>}]} {
    %c0 = arith.constant 0 : index
    %c0_0 = arith.constant 0 : index
    %c0_1 = arith.constant 0 : index
    %0 = vector.load %arg4[%c0, %c0_0, %c0_1] : memref<2x8x32xf32, #tpu.memory_space<vmem>>, vector<2x8x32xf32>
    %c0_2 = arith.constant 0 : index
    %c0_3 = arith.constant 0 : index
    %c0_4 = arith.constant 0 : index
    %1 = vector.load %arg3[%c0_2, %c0_3, %c0_4] : memref<2x8x32xf32, #tpu.memory_space<vmem>>, vector<2x8x32xf32>
    %c0_5 = arith.constant 0 : index
    %c0_6 = arith.constant 0 : index
    %c0_7 = arith.constant 0 : index
    %2 = vector.load %arg2[%c0_5, %c0_6, %c0_7] : memref<2x8x32xf32, #tpu.memory_space<vmem>>, vector<2x8x32xf32>
    "tpu.trace_start"() <{level = 10 : i32, message = "bqd,bkd->bqk"}> : () -> ()
    %cst = arith.constant dense<0.000000e+00> : vector<2x8x8xf32>
    %3 = tpu.matmul %0, %1, %cst {dimension_numbers = #tpu.dot_dimension_numbers<[2], [2], [1], [1], [0, 0, 0, 1, 1, 1], [0], [0]>} : vector<2x8x32xf32>, vector<2x8x32xf32>, vector<2x8x8xf32> -> vector<2x8x8xf32>
    "tpu.trace_stop"() : () -> ()
    %cst_8 = arith.constant 0.176776692 : f32
    %4 = vector.broadcast %cst_8 : f32 to vector<2x8x8xf32>
    %5 = arith.mulf %3, %4 : vector<2x8x8xf32>
    %cst_9 = arith.constant dense<0xFF800000> : vector<2x8xf32>
    %6 = vector.multi_reduction <maximumf>, %5, %cst_9 [2] : vector<2x8x8xf32> to vector<2x8xf32>
    %7 = vector.shape_cast %6 : vector<2x8xf32> to vector<2x8x1xf32>
    %8 = vector.broadcast %7 : vector<2x8x1xf32> to vector<2x8x8xf32>
    %9 = arith.subf %5, %8 : vector<2x8x8xf32>
    %10 = math.exp %9 : vector<2x8x8xf32>
    %cst_10 = arith.constant dense<0.000000e+00> : vector<2x8xf32>
    %11 = vector.multi_reduction <add>, %10, %cst_10 [2] : vector<2x8x8xf32> to vector<2x8xf32>
    %12 = vector.shape_cast %11 : vector<2x8xf32> to vector<2x8x1xf32>
    %13 = tpu.reciprocal %12 : vector<2x8x1xf32> -> vector<2x8x1xf32>
    %14 = vector.broadcast %13 : vector<2x8x1xf32> to vector<2x8x8xf32>
    %15 = arith.mulf %10, %14 : vector<2x8x8xf32>
    %c0_11 = arith.constant 0 : index
    %c0_12 = arith.constant 0 : index
    %c0_13 = arith.constant 0 : index
    %16 = vector.load %arg6[%c0_11, %c0_12, %c0_13] : memref<2x8x8xf32, #tpu.memory_space<vmem>>, vector<2x8x8xf32>
    tpu.vector_store %arg6[%c0_11, %c0_12, %c0_13], %15 {strides = array<i32>} : memref<2x8x8xf32, #tpu.memory_space<vmem>>, vector<2x8x8xf32>,
    "tpu.trace_start"() <{level = 10 : i32, message = "bqk,bkv->bqv"}> : () -> ()
    %cst_14 = arith.constant dense<0.000000e+00> : vector<2x8x32xf32>
    %17 = tpu.matmul %15, %2, %cst_14 {dimension_numbers = #tpu.dot_dimension_numbers<[2], [1], [1], [2], [0, 0, 0, 1, 1, 2], [0], [0]>} : vector<2x8x8xf32>, vector<2x8x32xf32>, vector<2x8x32xf32> -> vector<2x8x32xf32>
    "tpu.trace_stop"() : () -> ()
    %c0_15 = arith.constant 0 : index
    %c0_16 = arith.constant 0 : index
    %c0_17 = arith.constant 0 : index
    %18 = vector.load %arg5[%c0_15, %c0_16, %c0_17] : memref<2x8x32xf32, #tpu.memory_space<vmem>>, vector<2x8x32xf32>
    tpu.vector_store %arg5[%c0_15, %c0_16, %c0_17], %17 {strides = array<i32>} : memref<2x8x32xf32, #tpu.memory_space<vmem>>, vector<2x8x32xf32>,
    return
  }
  func.func @transform_0(%arg0: i32, %arg1: i32) -> (i32, i32, i32) {
    %c0_i32 = arith.constant 0 : i32
    %c0_i32_0 = arith.constant 0 : i32
    %c0_i32_1 = arith.constant 0 : i32
    return %arg0, %c0_i32, %c0_i32_0 : i32, i32, i32
  }
  func.func @transform_1(%arg0: i32, %arg1: i32) -> (i32, i32, i32) {
    %c0_i32 = arith.constant 0 : i32
    %c0_i32_0 = arith.constant 0 : i32
    %c0_i32_1 = arith.constant 0 : i32
    return %arg0, %c0_i32, %c0_i32_0 : i32, i32, i32
  }
  func.func @transform_2(%arg0: i32, %arg1: i32) -> (i32, i32, i32) {
    %c0_i32 = arith.constant 0 : i32
    %c0_i32_0 = arith.constant 0 : i32
    return %arg0, %arg1, %c0_i32 : i32, i32, i32
  }
  func.func @transform_3(%arg0: i32, %arg1: i32) -> (i32, i32, i32) {
    %c0_i32 = arith.constant 0 : i32
    %c0_i32_0 = arith.constant 0 : i32
    return %arg0, %arg1, %c0_i32 : i32, i32, i32
  }
  func.func @transform_4(%arg0: i32, %arg1: i32) -> (i32, i32, i32) {
    %c0_i32 = arith.constant 0 : i32
    %c0_i32_0 = arith.constant 0 : i32
    return %arg0, %arg1, %c0_i32 : i32, i32, i32
  }
}

</mosaic_0001>

<bundles_post_ra>
// kernel: tpu_custom_call.1
= control target key start
LH: loop header
LB: loop body
LE: loop exit
PB: predicated region body
PF: predicated region fallthrough
CT: control target
= control target key end

     0   :  { %10 = vsyncpa [#allocation3], 0  ;;  %s664_s0 = inlined_call_operand.hbm [shape: f32[2,8,32], index: 0, kind: input, shape index: {}]   ;;  %s665_s1 = inlined_call_operand.hbm [shape: f32[2,8,32], index: 1, kind: input, shape index: {}]   ;;  %s666_s2 = inlined_call_operand.hbm [shape: f32[2,8,32], index: 2, kind: input, shape index: {}]   ;;  %s667_s3 = inlined_call_operand.hbm [shape: f32[2,8,32], index: 3, kind: output, shape index: {0}]   ;;  %s668_s4 = inlined_call_operand.hbm [shape: f32[2,8,8], index: 4, kind: output, shape index: {1}]  }
   0x1   :  { %11 = vsyncpa [#allocation6], 0 }
   0x2   :  { %12 = vsyncpa [#allocation4], 0 }
   0x3   :  { %13 = vsyncpa [#allocation10], 0  ;;  %s586_s15 = smov [#allocation5]   ;;  %s587_s17 = smov [#allocation2]  }
   0x4   :  { %s31_s16 = sshll.u32 %s586_s15, 4  ;;  %s19_s18 = sshll.u32 %s587_s17, 4  ;;  %s32_s16 = int_to_ptr.vmem [resolvable:$true] %s31_s16  ;;  %s20_s18 = int_to_ptr.vmem [resolvable:$true] %s19_s18 }
   0x5   :  { %s486_s19 = scalar_lea.vmem %s32_s16, 256  ;;  %p491_p1 = scmp.lt.s32.totalorder %s32_s16, %s32_s16 }
   0x6   :  { %p487_p0 = scmp.ne.s32.totalorder %s32_s16, %s486_s19  ;;  %p492_p2 = scmp.lt.s32.totalorder %s486_s19, %s486_s19 }
   0x8   :  { %p493_p3 = por %p492_p2, %p491_p1 }
   0xa   :  { %p494_p4 = pnand %p493_p3, %p487_p0 }
   0xc   :  { %497 = shalt.err (!%p494_p4)
}
   0xd   :  { %s588_s20 = smov 128   ;;  %s589_s21 = smov 8  }
   0xe   :  { %37 = dma.hbm_to_vmem [thread:$0]  %s665_s1, 256, %s32_s16, [#allocation6], %s588_s20, %s588_s20, %s589_s21  }
   0xf   :  { %s506_s24 = scalar_lea.vmem %s20_s18, 256  ;;  %p511_p6 = scmp.lt.s32.totalorder %s20_s18, %s20_s18 }
  0x10   :  { %p507_p5 = scmp.ne.s32.totalorder %s20_s18, %s506_s24  ;;  %p512_p7 = scmp.lt.s32.totalorder %s506_s24, %s506_s24 }
  0x12   :  { %p513_p8 = por %p512_p7, %p511_p6 }
  0x14   :  { %p514_p9 = pnand %p513_p8, %p507_p5 }
  0x16   :  { %517 = shalt.err (!%p514_p9)
}
  0x17   :  { %25 = dma.hbm_to_vmem [thread:$0]  %s664_s0, 256, %s20_s18, [#allocation3], %s588_s20, %s588_s20, %s589_s21  }
  0x18   :  { %s590_s27 = smov [#allocation7]  }
  0x19   :  { %s43_s28 = sshll.u32 %s590_s27, 4  ;;  %s44_s28 = int_to_ptr.vmem [resolvable:$true] %s43_s28 }
  0x1a   :  { %s526_s29 = scalar_lea.vmem %s44_s28, 256  ;;  %p531_p11 = scmp.lt.s32.totalorder %s44_s28, %s44_s28 }
  0x1b   :  { %p527_p10 = scmp.ne.s32.totalorder %s44_s28, %s526_s29  ;;  %p532_p12 = scmp.lt.s32.totalorder %s526_s29, %s526_s29 }
  0x1d   :  { %p533_p13 = por %p532_p12, %p531_p11 }
  0x1f   :  { %p534_p0 = pnand %p533_p13, %p527_p10 }
  0x21   :  { %537 = shalt.err (!%p534_p0)
}
  0x22   :  { %49 = dma.hbm_to_vmem [thread:$0]  %s666_s2, 256, %s44_s28, [#allocation6], %s588_s20, %s588_s20, %s589_s21  }
  0x23   :  { %578 = dma.done.wait [#allocation3], 256  }
  0x24   :  { %579 = vsyncadd [#allocation3], 4294967040 }
  0x25   :  { %580 = dma.done.wait [#allocation6], 512  }
  0x26   :  { %581 = vsyncadd [#allocation6], 4294966784  ;;  %v591_v0 = vmov 0.0   ;;  %vm592_vm0 = vmmov 0   ;;  %vm65_vm1 = vcmask 261120   ;;  %v61_v1 = vld [vmem:[#allocation5] sm:$0xff] }
  0x27   :  { %441 = vmatprep.subr.mxu0 %v591_v0  ;;  %446 = vmatprep.subr.mxu1 %v591_v0  ;;  %v62_v2 = vld [vmem:[#allocation5 + $0x8] sm:$0xff]  ;;  %v59_v3 = vld [vmem:[#allocation7] sm:$0xff]  ;;  %v60_v4 = vld [vmem:[#allocation7 + $0x8] sm:$0xff]  ;;  %vm220_vm2 = vcmask 64512   ;;  %s593_s0 = smov [#allocation9]  }
  0x28   :  { %443 = vmatprep.mubr.msk.f32.mxu0 %vm592_vm0, %v591_v0  ;;  %448 = vmatprep.mubr.msk.f32.mxu1 %vm592_vm0, %v591_v0  ;;  %v63_v23 = vld [vmem:[#allocation2] sm:$0xff]  ;;  %v64_v24 = vld [vmem:[#allocation2 + $0x8] sm:$0xff]  ;;  %s410_s2 = sshll.u32 %s593_s0, 4  ;;  %s411_s2 = int_to_ptr.vmem [resolvable:$true] %s410_s2 }
  0x29   :  { %442 = vmatpush3.xpose.msk.msra.mxu0 %vm65_vm1, %v61_v1  ;;  %447 = vmatpush3.xpose.msk.msra.mxu1 %vm65_vm1, %v62_v2  ;;  %s538_s5 = scalar_lea.vmem %s411_s2, 256  ;;  %p543_p2 = scmp.lt.s32.totalorder %s411_s2, %s411_s2 }
  0x2a   :  { %451 = vmatprep.subr.mxu0 %v591_v0  ;;  %456 = vmatprep.subr.mxu1 %v591_v0  ;;  %p539_p1 = scmp.ne.s32.totalorder %s411_s2, %s538_s5  ;;  %p544_p3 = scmp.lt.s32.totalorder %s538_s5, %s538_s5 }
  0x2c   :  { %444 = vmatmul.mubr.msk.f32.vlgmr.msra.gmra.mxu0 %vm65_vm1, %v59_v3  ;;  %449 = vmatmul.mubr.msk.f32.vlgmr.msra.gmra.mxu1 %vm65_vm1, %v60_v4  ;;  %p545_p4 = por %p544_p3, %p543_p2 }
  0x2d   :  { %453 = vmatprep.mubr.msk.f32.mxu0 %vm592_vm0, %v591_v0  ;;  %458 = vmatprep.mubr.msk.f32.mxu1 %vm592_vm0, %v591_v0 }
  0x2e   :  { %452 = vmatpush3.msra.mxu0 %v63_v23  ;;  %457 = vmatpush3.msra.mxu1 %v64_v24  ;;  %p546_p5 = pnand %p545_p4, %p539_p1 }
  0xec   :  { %v138_v5 = vpop.f32.mrf.mxu0  ;;  %v214_v6 = vpop.f32.mrf.mxu1 }
  0xed   :  { %v218_v7 = vmul.f32 0.17677669, %v138_v5  ;;  %v219_v8 = vmul.f32 0.17677669, %v214_v6 }
  0xee   :  { %v445_v9 = vpop.f32.mrf.mxu0  ;;  %v450_v10 = vpop.f32.mrf.mxu1 }
  0xef   :  { %v221_v11 = vsel %vm220_vm2, %v218_v7, -inf  ;;  %v224_v12 = vsel %vm220_vm2, %v219_v8, -inf }
  0xf0   :  { %222 = vmax.xlane.f32.xlu0 %v221_v11 }
  0xf4   :  { %225 = vmax.xlane.f32.xlu0 %v224_v12 }
 0x179   :  { %v223_v13 = vpop.xlane.xlu0 %222 }
 0x17a   :  { %v227_v14 = vsub.f32 %v218_v7, %v223_v13 }
 0x17c   :  { %v229_v15 = vmul.f32 1.442695, %v227_v14 }
 0x17d   :  { %v226_v16 = vpop.xlane.xlu0 %225 }
 0x17e   :  { %470 = vpow2.f32 %v229_v15  ;;  %v228_v17 = vsub.f32 %v219_v8, %v226_v16 }
 0x180   :  { %v231_v18 = vmul.f32 1.442695, %v228_v17 }
 0x182   :  { %472 = vpow2.f32 %v231_v18 }
 0x18b   :  { %v471_v19 = vpop.eup %470 }
 0x18c   :  { %v233_v20 = vsel %vm220_vm2, %v471_v19, 0.0 }
 0x18d   :  { %234 = vadd.xlane.f32.xlu1 %v233_v20 }
 0x18f   :  { %v473_v21 = vpop.eup %472 }
 0x190   :  { %v236_v22 = vsel %vm220_vm2, %v473_v21, 0.0 }
 0x191   :  { %237 = vadd.xlane.f32.xlu1 %v236_v22 }
 0x216   :  { %v235_v25 = vpop.xlane.xlu1 %234 }
 0x217   :  { %474 = vrcp.f32 %v235_v25 }
 0x21a   :  { %v238_v26 = vpop.xlane.xlu1 %237 }
 0x21b   :  { %476 = vrcp.f32 %v238_v26 }
 0x224   :  { %v475_v27 = vpop.eup %474 }
 0x225   :  { %v241_v28 = vmul.f32 %v475_v27, %v471_v19 }
 0x227   :  { %454 = vmatmul.mubr.msk.f32.vlgmr.msra.gmra.mxu0 %vm220_vm2, %v241_v28  ;;  %243 = vst.msk [vmem:[#allocation9] sm:$0xff] %vm220_vm2, %v241_v28 }
 0x228   :  { %v477_v29 = vpop.eup %476 }
 0x229   :  { %v242_v30 = vmul.f32 %v477_v29, %v473_v21 }
 0x22b   :  { %459 = vmatmul.mubr.msk.f32.vlgmr.msra.gmra.mxu1 %vm220_vm2, %v242_v30  ;;  %244 = vst.msk [vmem:[#allocation9 + $0x8] sm:$0xff] %vm220_vm2, %v242_v30 }
 0x22c   :  { %549 = shalt.err (!%p546_p5)
}
 0x22d   :  { %416 = dma.vmem_to_hbm [thread:$0]  %s411_s2, 256, %s668_s4, [#allocation10], %s588_s20, %s588_s20, %s589_s21  }
 0x22e   :  { %s594_s8 = smov [#allocation8]  }
 0x22f   :  { %s398_s9 = sshll.u32 %s594_s8, 4  ;;  %s399_s9 = int_to_ptr.vmem [resolvable:$true] %s398_s9 }
 0x230   :  { %s558_s10 = scalar_lea.vmem %s399_s9, 256  ;;  %p563_p7 = scmp.lt.s32.totalorder %s399_s9, %s399_s9 }
 0x231   :  { %p559_p6 = scmp.ne.s32.totalorder %s399_s9, %s558_s10  ;;  %p564_p8 = scmp.lt.s32.totalorder %s558_s10, %s558_s10 }
 0x233   :  { %p565_p9 = por %p564_p8, %p563_p7 }
 0x235   :  { %p566_p10 = pnand %p565_p9, %p559_p6 }
 0x2e7   :  { %v314_v31 = vpop.f32.mrf.mxu0 }
 0x2e8   :  { %391 = vst.msk [vmem:[#allocation8] sm:$0xff] %vm65_vm1, %v314_v31 }
 0x2e9   :  { %v455_v32 = vpop.f32.mrf.mxu0 }
 0x2eb   :  { %v387_v33 = vpop.f32.mrf.mxu1 }
 0x2ec   :  { %392 = vst.msk [vmem:[#allocation8 + $0x8] sm:$0xff] %vm65_vm1, %v387_v33 }
 0x2ed   :  { %v460_v34 = vpop.f32.mrf.mxu1 }
 0x2ee   :  { %569 = shalt.err (!%p566_p10)
}
 0x2ef   :  { %404 = dma.vmem_to_hbm [thread:$0]  %s399_s9, 256, %s667_s3, [#allocation4], %s588_s20, %s588_s20, %s589_s21  }
 0x2f0   :  { %582 = dma.done.wait [#allocation4], 256  }
 0x2f1   :  { %583 = vsyncadd [#allocation4], 4294967040 }
 0x2f2   :  { %584 = dma.done.wait [#allocation10], 256  }
 0x2f3   :  { %585 = vsyncadd [#allocation10], 4294967040 }
 0x2f4   :  { %423 = vsyncpa [#allocation3], 1 }
 0x2f5   :  { %424 = vsyncpa [#allocation6], 1 }
 0x2f6   :  { %425 = vsyncpa [#allocation4], 1 }
 0x2f7   :  { %426 = vsyncpa [#allocation10], 1 }

</bundles_post_ra>
